<compile_context>
chip_gen: v5e
topology: v5e:2x2
jax: 0.10.0
libtpu: 0.0.40
codegen_flags: <defaults>
</compile_context>

<pallas_src>
import functools

import jax
import jax.numpy as jnp
from jax.experimental import pallas as pl
from jax.experimental.pallas import tpu as pltpu


def _round_up(x, m):
    return (x + m - 1) // m * m


def _cdiv(a, b):
    return -(-a // b)


def _ucshift_kernel(sim_ref, coef_ref, label_ref, out_ref, l_ref, t_ref,
                    *, s, margin, n_pad_cols):
    kc = pl.program_id(1)
    nc = pl.num_programs(1)

    @pl.when(kc == 0)
    def _():
        l_ref[...] = jnp.zeros_like(l_ref)
        t_ref[...] = jnp.zeros_like(t_ref)

    sim = sim_ref[...].astype(jnp.float32)        # (TB, TC); cast after VMEM load
    tb, tc = sim.shape

    cu = coef_ref[:, 0:1]                          # s*cos(uc)            (TB, 1)
    su = coef_ref[:, 1:2]                          # s*sin(uc)            (TB, 1)
    lab_local = label_ref[...] - kc * tc           # target column inside this tile

    col = jax.lax.broadcasted_iota(jnp.int32, (tb, tc), 1)
    is_tgt = col == lab_local                      # (TB, TC)

    # ArcFace angle-addition identity with s folded into the row coefficients:
    #   non-target: s*cos(acos(x) - uc)        = x*(s cos uc)     + sqrt(1-x^2)*(s sin uc)
    #   target:     s*cos(acos(x) + uc + m)    = x*(s cos(uc+m))  - sqrt(1-x^2)*(s sin(uc+m))
    sim_c = jnp.clip(sim, -0.99, 0.99)
    sq = jnp.sqrt(1.0 - sim_c * sim_c)             # = sin(acos(sim_c)) >= 0
    if margin == 0.0:
        z = sim_c * cu + sq * jnp.where(is_tgt, -su, su)
    else:
        cum = coef_ref[:, 2:3]                     # s*cos(uc+margin)
        smm = coef_ref[:, 3:4]                     # s*sin(uc+margin)
        z = sim_c * jnp.where(is_tgt, cum, cu) + sq * jnp.where(is_tgt, -smm, su)

    # Fixed-shift softmax: |z| <= s, so zs in [-2s, 0] and exp(zs) in [e^-2s, 1].
    zs = z - s
    l_ref[...] += jnp.sum(jnp.exp(zs), axis=-1, keepdims=True)
    t_ref[...] += jnp.sum(jnp.where(is_tgt, zs, 0.0), axis=-1, keepdims=True)

    # ---- finalize: CE_row = logsumexp - z_tgt = (s + log l) - (zs_tgt + s) ----
    @pl.when(kc == nc - 1)
    def _():
        l = l_ref[...]
        if n_pad_cols > 0:
            # Padded class columns were filled with -1.0 (clips to -0.99) and are
            # never targets; remove their exact contribution from the denominator.
            ps = jnp.float32(-0.99)
            pq = jnp.sqrt(1.0 - ps * ps)
            l = l - jnp.float32(n_pad_cols) * jnp.exp(ps * cu + pq * su - s)
        out_ref[...] = jnp.log(l) - t_ref[...]


def ucshift_cls_loss(similarity, fn, wn, uc, label, *,
                     s=30.0, margin=0.0, la=10.0, ua=110.0, k=3.0,
                     lambda_g=1.0, tb_max=256, tc_max=4096):
    """Forward of UCShiftCLSLoss. `wn` is unused (matches the PyTorch module)."""
    del wn
    B, C = similarity.shape

    # ---- tile selection ----
    # B axis: at least 2 tiles when possible so the "parallel" axis can feed
    # both TensorCores on v7x; tiles stay multiples of 8 sublanes.
    Bmin = _round_up(B, 8)
    n_b = max(2, _cdiv(Bmin, tb_max))
    TB = min(tb_max, max(8, _round_up(_cdiv(Bmin, n_b), 8)))
    Bp = _round_up(Bmin, TB)
    # C axis: lane-dense tiles of up to tc_max, sized to minimize class padding.
    Cmin = _round_up(C, 128)
    n_c = _cdiv(Cmin, tc_max)
    TC = _round_up(_cdiv(Cmin, n_c), 128)
    Cp = n_c * TC

    # Pad with -1.0: padded class columns clip to -0.99 and are exactly removed
    # at finalize; padded rows are sliced away below.
    sim = similarity                      # keep native dtype; kernel casts after load
    if (Bp, Cp) != (B, C):
        sim = jnp.pad(sim, ((0, Bp - B), (0, Cp - C)), constant_values=-1.0)

    # Per-row coefficients precomputed in the wrapper (O(B)); s folded in.
    uc32 = uc.astype(jnp.float32)
    sf = jnp.float32(s)
    coef = jnp.stack([sf * jnp.cos(uc32), sf * jnp.sin(uc32),
                      sf * jnp.cos(uc32 + margin), sf * jnp.sin(uc32 + margin)],
                     axis=-1)                                  # (B, 4) f32
    lab2 = label.astype(jnp.int32).reshape(B, 1)
    if Bp != B:
        coef = jnp.pad(coef, ((0, Bp - B), (0, 0)))
        lab2 = jnp.pad(lab2, ((0, Bp - B), (0, 0)))

    kernel = functools.partial(_ucshift_kernel, s=float(s),
                               margin=float(margin), n_pad_cols=int(Cp - C))

    row_loss = pl.pallas_call(
        kernel,
        out_shape=jax.ShapeDtypeStruct((Bp, 1), jnp.float32),
        grid_spec=pltpu.PrefetchScalarGridSpec(
            num_scalar_prefetch=0,
            grid=(Bp // TB, Cp // TC),
            in_specs=[
                pl.BlockSpec((TB, TC), lambda bi, kc: (bi, kc)),   # similarity
                pl.BlockSpec((TB, 4), lambda bi, kc: (bi, 0)),     # row coefficients
                pl.BlockSpec((TB, 1), lambda bi, kc: (bi, 0)),     # label
            ],
            out_specs=pl.BlockSpec((TB, 1), lambda bi, kc: (bi, 0)),
            scratch_shapes=[pltpu.VMEM((TB, 1), jnp.float32)] * 2,  # l, t
        ),
        compiler_params=pltpu.CompilerParams(
            dimension_semantics=("parallel", "arbitrary"),
            vmem_limit_bytes=48 * 1024 * 1024,
        ),
    )(sim, coef, lab2)

    loss = jnp.sum(row_loss[:B, 0]) / B

    # Norm regularizer ('exp' branch of g(), k=3 for reg_type='exp_3'). It
    # cancels exactly in the forward value (loss + reg - reg.detach()); computed
    # in plain JAX (O(B)) to keep module semantics off the kernel's hot path.
    fn32 = fn.astype(jnp.float32)
    nx = (fn32 - la) / (ua - la)
    reg = jnp.exp(-nx * k) / k
    ug = 2.7183 ** (-k)
    reg = jnp.mean((reg + ug * nx) / (1.0 - ug)) * lambda_g
    return loss + reg - jax.lax.stop_gradient(reg)


def _reference(similarity, fn, uc, label, *, s=30.0, margin=0.0,
               la=10.0, ua=110.0, k=3.0, lambda_g=1.0):
    B, C = similarity.shape
    one_hot = jax.nn.one_hot(label, C, dtype=jnp.float32)
    sim32 = similarity.astype(jnp.float32)
    dist = -jnp.arccos(jnp.clip(sim32, -0.99, 0.99))
    dist = dist + (1.0 - one_hot) * uc[:, None] - one_hot * uc[:, None]
    logits = s * jnp.cos(-dist + one_hot * margin)
    lse = jax.nn.logsumexp(logits, axis=-1)
    tgt = jnp.sum(logits * one_hot, axis=-1)
    loss = jnp.mean(lse - tgt)
    nx = (fn - la) / (ua - la)
    reg = jnp.exp(-nx * k) / k
    ug = 2.7183 ** (-k)
    reg = jnp.mean((reg + ug * nx) / (1.0 - ug)) * lambda_g
    return loss + reg - jax.lax.stop_gradient(reg)


if __name__ == "__main__":
    # TODO(synk): the module's running EMA stats (avg_m/min_m/max_m/avg_l) are
    # host-side Python side-effects and are not part of the returned loss.
    key = jax.random.PRNGKey(0)

    # --- test 1: default config; exercises row padding (12->16) and class
    #     padding (40->128) plus the 2-B-tile megacore path.
    B, C = 12, 40
    k1, k2, k3, k4, k5 = jax.random.split(key, 5)
    similarity = jax.random.uniform(k1, (B, C), jnp.float32, -1.0, 1.0)
    fn = jax.random.uniform(k2, (B,), jnp.float32, 10.0, 110.0)   # feature norms
    wn = jax.random.uniform(k3, (C,), jnp.float32, 0.5, 1.5)      # unused by fwd
    uc = jax.random.uniform(k4, (B,), jnp.float32, 0.05, 0.25)    # per-sample shift
    label = jax.random.randint(k5, (B,), 0, C, jnp.int32)

    out = jax.block_until_ready(ucshift_cls_loss(similarity, fn, wn, uc, label))
    ref = _reference(similarity, fn, uc, label)
    assert jnp.allclose(out, ref, atol=2e-4, rtol=2e-4), (out, ref)

    # --- test 2: nonzero margin and a small tc_max so the class axis spans
    #     multiple grid tiles (exercises accumulation + pad correction).
    B2, C2, margin2 = 12, 300, 0.3
    j1, j2, j3, j4, j5 = jax.random.split(jax.random.PRNGKey(1), 5)
    sim2 = jax.random.uniform(j1, (B2, C2), jnp.float32, -1.0, 1.0)
    fn2 = jax.random.uniform(j2, (B2,), jnp.float32, 10.0, 110.0)
    wn2 = jax.random.uniform(j3, (C2,), jnp.float32, 0.5, 1.5)
    uc2 = jax.random.uniform(j4, (B2,), jnp.float32, 0.05, 0.25)
    lab2 = jax.random.randint(j5, (B2,), 0, C2, jnp.int32)

    out2 = jax.block_until_ready(
        ucshift_cls_loss(sim2, fn2, wn2, uc2, lab2, margin=margin2, tc_max=128))
    ref2 = _reference(sim2, fn2, uc2, lab2, margin=margin2)
    assert jnp.allclose(out2, ref2, atol=2e-4, rtol=2e-4), (out2, ref2)

    print("KERNEL_OK")
</pallas_src>

<mosaic_0001>
module attributes {stable_mosaic.version = 11 : i64} {
  func.func @_ucshift_kernel(%arg0: i32, %arg1: i32, %arg2: memref<8x128xf32, #tpu.memory_space<vmem>>, %arg3: memref<8x4xf32, #tpu.memory_space<vmem>>, %arg4: memref<8x1xi32, #tpu.memory_space<vmem>>, %arg5: memref<8x1xf32, #tpu.memory_space<vmem>>, %arg6: memref<8x1xf32, #tpu.memory_space<vmem>>, %arg7: memref<8x1xf32, #tpu.memory_space<vmem>>) attributes {dimension_semantics = [#tpu.dimension_semantics<parallel>, #tpu.dimension_semantics<arbitrary>], iteration_bounds = array<i64: 2, 1>, scalar_prefetch = 0 : i64, scratch_operands = 2 : i64, tpu.core_type = #tpu.core_type<tc>, window_params = [{transform_indices = @transform_0, window_bounds = array<i64: 8, 128>}, {transform_indices = @transform_1, window_bounds = array<i64: 8, 4>}, {transform_indices = @transform_2, window_bounds = array<i64: 8, 1>}, {transform_indices = @transform_3, window_bounds = array<i64: 8, 1>}]} {
    %c0_i32 = arith.constant 0 : i32
    %0 = arith.cmpi eq, %arg1, %c0_i32 : i32
    %1 = arith.extui %0 : i1 to i32
    %c0_i32_0 = arith.constant 0 : i32
    %2 = arith.cmpi ne, %1, %c0_i32_0 : i32
    scf.if %2 {
      %cst_24 = arith.constant 0.000000e+00 : f32
      %50 = vector.broadcast %cst_24 : f32 to vector<8x1xf32>
      %c0_25 = arith.constant 0 : index
      %c0_26 = arith.constant 0 : index
      %51 = vector.load %arg6[%c0_25, %c0_26] : memref<8x1xf32, #tpu.memory_space<vmem>>, vector<8x1xf32>
      tpu.vector_store %arg6[%c0_25, %c0_26], %50 {strides = array<i32>} : memref<8x1xf32, #tpu.memory_space<vmem>>, vector<8x1xf32>,
      %cst_27 = arith.constant 0.000000e+00 : f32
      %52 = vector.broadcast %cst_27 : f32 to vector<8x1xf32>
      %c0_28 = arith.constant 0 : index
      %c0_29 = arith.constant 0 : index
      %53 = vector.load %arg7[%c0_28, %c0_29] : memref<8x1xf32, #tpu.memory_space<vmem>>, vector<8x1xf32>
      tpu.vector_store %arg7[%c0_28, %c0_29], %52 {strides = array<i32>} : memref<8x1xf32, #tpu.memory_space<vmem>>, vector<8x1xf32>,
    } else {
    }
    %c0 = arith.constant 0 : index
    %c0_1 = arith.constant 0 : index
    %3 = vector.load %arg2[%c0, %c0_1] : memref<8x128xf32, #tpu.memory_space<vmem>>, vector<8x128xf32>
    %c0_2 = arith.constant 0 : index
    %c0_3 = arith.constant 0 : index
    %4 = vector.load %arg3[%c0_2, %c0_3] : memref<8x4xf32, #tpu.memory_space<vmem>>, vector<8x1xf32>
    %c0_4 = arith.constant 0 : index
    %c1 = arith.constant 1 : index
    %5 = vector.load %arg3[%c0_4, %c1] : memref<8x4xf32, #tpu.memory_space<vmem>>, vector<8x1xf32>
    %c0_5 = arith.constant 0 : index
    %c0_6 = arith.constant 0 : index
    %6 = vector.load %arg4[%c0_5, %c0_6] : memref<8x1xi32, #tpu.memory_space<vmem>>, vector<8x1xi32>
    %c128_i32 = arith.constant 128 : i32
    %7 = arith.muli %arg1, %c128_i32 : i32
    %8 = vector.broadcast %7 : i32 to vector<8x1xi32>
    %9 = arith.subi %6, %8 : vector<8x1xi32>
    %10 = tpu.iota {dimensions = array<i32: 1>} : vector<8x128xi32>
    %11 = vector.broadcast %9 : vector<8x1xi32> to vector<8x128xi32>
    %12 = arith.cmpi eq, %10, %11 : vector<8x128xi32>
    %cst = arith.constant -9.900000e-01 : f32
    %cst_7 = arith.constant 9.900000e-01 : f32
    %13 = vector.broadcast %cst : f32 to vector<8x128xf32>
    %14 = arith.maximumf %13, %3 : vector<8x128xf32>
    %15 = vector.broadcast %cst_7 : f32 to vector<8x128xf32>
    %16 = arith.minimumf %15, %14 : vector<8x128xf32>
    %17 = arith.mulf %16, %16 : vector<8x128xf32>
    %cst_8 = arith.constant 1.000000e+00 : f32
    %18 = vector.broadcast %cst_8 : f32 to vector<8x128xf32>
    %19 = arith.subf %18, %17 : vector<8x128xf32>
    %20 = math.sqrt %19 : vector<8x128xf32>
    %21 = vector.broadcast %4 : vector<8x1xf32> to vector<8x128xf32>
    %22 = arith.mulf %16, %21 : vector<8x128xf32>
    %cst_9 = arith.constant 0.000000e+00 : f32
    %23 = vector.broadcast %cst_9 : f32 to vector<8x1xf32>
    %24 = arith.subf %23, %5 : vector<8x1xf32>
    %25 = vector.shape_cast %24 : vector<8x1xf32> to vector<8x1xf32>
    %26 = vector.broadcast %25 : vector<8x1xf32> to vector<8x128xf32>
    %27 = vector.shape_cast %5 : vector<8x1xf32> to vector<8x1xf32>
    %28 = vector.broadcast %27 : vector<8x1xf32> to vector<8x128xf32>
    %29 = arith.select %12, %26, %28 : vector<8x128xi1>, vector<8x128xf32>
    %30 = arith.mulf %20, %29 : vector<8x128xf32>
    %31 = arith.addf %22, %30 : vector<8x128xf32>
    %cst_10 = arith.constant 3.000000e+01 : f32
    %32 = vector.broadcast %cst_10 : f32 to vector<8x128xf32>
    %33 = arith.subf %31, %32 : vector<8x128xf32>
    %c0_11 = arith.constant 0 : index
    %c0_12 = arith.constant 0 : index
    %34 = vector.load %arg6[%c0_11, %c0_12] : memref<8x1xf32, #tpu.memory_space<vmem>>, vector<8x1xf32>
    %35 = math.exp %33 : vector<8x128xf32>
    %cst_13 = arith.constant dense<0.000000e+00> : vector<8xf32>
    %36 = vector.multi_reduction <add>, %35, %cst_13 [1] : vector<8x128xf32> to vector<8xf32>
    %37 = vector.shape_cast %36 : vector<8xf32> to vector<8x1xf32>
    %38 = arith.addf %34, %37 : vector<8x1xf32>
    %c0_14 = arith.constant 0 : index
    %c0_15 = arith.constant 0 : index
    %39 = vector.load %arg6[%c0_14, %c0_15] : memref<8x1xf32, #tpu.memory_space<vmem>>, vector<8x1xf32>
    tpu.vector_store %arg6[%c0_14, %c0_15], %38 {strides = array<i32>} : memref<8x1xf32, #tpu.memory_space<vmem>>, vector<8x1xf32>,
    %c0_16 = arith.constant 0 : index
    %c0_17 = arith.constant 0 : index
    %40 = vector.load %arg7[%c0_16, %c0_17] : memref<8x1xf32, #tpu.memory_space<vmem>>, vector<8x1xf32>
    %cst_18 = arith.constant 0.000000e+00 : f32
    %41 = vector.broadcast %cst_18 : f32 to vector<8x128xf32>
    %42 = arith.select %12, %33, %41 : vector<8x128xi1>, vector<8x128xf32>
    %cst_19 = arith.constant dense<0.000000e+00> : vector<8xf32>
    %43 = vector.multi_reduction <add>, %42, %cst_19 [1] : vector<8x128xf32> to vector<8xf32>
    %44 = vector.shape_cast %43 : vector<8xf32> to vector<8x1xf32>
    %45 = arith.addf %40, %44 : vector<8x1xf32>
    %c0_20 = arith.constant 0 : index
    %c0_21 = arith.constant 0 : index
    %46 = vector.load %arg7[%c0_20, %c0_21] : memref<8x1xf32, #tpu.memory_space<vmem>>, vector<8x1xf32>
    tpu.vector_store %arg7[%c0_20, %c0_21], %45 {strides = array<i32>} : memref<8x1xf32, #tpu.memory_space<vmem>>, vector<8x1xf32>,
    %c0_i32_22 = arith.constant 0 : i32
    %47 = arith.cmpi eq, %arg1, %c0_i32_22 : i32
    %48 = arith.extui %47 : i1 to i32
    %c0_i32_23 = arith.constant 0 : i32
    %49 = arith.cmpi ne, %48, %c0_i32_23 : i32
    scf.if %49 {
      %c0_24 = arith.constant 0 : index
      %c0_25 = arith.constant 0 : index
      %50 = vector.load %arg6[%c0_24, %c0_25] : memref<8x1xf32, #tpu.memory_space<vmem>>, vector<8x1xf32>
      %cst_26 = arith.constant -9.900000e-01 : f32
      %cst_27 = arith.constant -9.900000e-01 : f32
      %51 = arith.mulf %cst_26, %cst_27 : f32
      %cst_28 = arith.constant 1.000000e+00 : f32
      %52 = arith.subf %cst_28, %51 : f32
      %53 = math.sqrt %52 : f32
      %cst_29 = arith.constant -9.900000e-01 : f32
      %54 = vector.broadcast %cst_29 : f32 to vector<8x1xf32>
      %55 = arith.mulf %54, %4 : vector<8x1xf32>
      %56 = vector.broadcast %53 : f32 to vector<8x1xf32>
      %57 = arith.mulf %56, %5 : vector<8x1xf32>
      %58 = arith.addf %55, %57 : vector<8x1xf32>
      %cst_30 = arith.constant 3.000000e+01 : f32
      %59 = vector.broadcast %cst_30 : f32 to vector<8x1xf32>
      %60 = arith.subf %58, %59 : vector<8x1xf32>
      %61 = math.exp %60 : vector<8x1xf32>
      %cst_31 = arith.constant 8.800000e+01 : f32
      %62 = vector.broadcast %cst_31 : f32 to vector<8x1xf32>
      %63 = arith.mulf %62, %61 : vector<8x1xf32>
      %64 = arith.subf %50, %63 : vector<8x1xf32>
      %65 = math.log %64 : vector<8x1xf32>
      %c0_32 = arith.constant 0 : index
      %c0_33 = arith.constant 0 : index
      %66 = vector.load %arg7[%c0_32, %c0_33] : memref<8x1xf32, #tpu.memory_space<vmem>>, vector<8x1xf32>
      %67 = arith.subf %65, %66 : vector<8x1xf32>
      %c0_34 = arith.constant 0 : index
      %c0_35 = arith.constant 0 : index
      %68 = vector.load %arg5[%c0_34, %c0_35] : memref<8x1xf32, #tpu.memory_space<vmem>>, vector<8x1xf32>
      tpu.vector_store %arg5[%c0_34, %c0_35], %67 {strides = array<i32>} : memref<8x1xf32, #tpu.memory_space<vmem>>, vector<8x1xf32>,
    } else {
    }
    return
  }
  func.func @transform_0(%arg0: i32, %arg1: i32) -> (i32, i32) {
    %c0_i32 = arith.constant 0 : i32
    return %arg0, %arg1 : i32, i32
  }
  func.func @transform_1(%arg0: i32, %arg1: i32) -> (i32, i32) {
    %c0_i32 = arith.constant 0 : i32
    %c0_i32_0 = arith.constant 0 : i32
    return %arg0, %c0_i32 : i32, i32
  }
  func.func @transform_2(%arg0: i32, %arg1: i32) -> (i32, i32) {
    %c0_i32 = arith.constant 0 : i32
    %c0_i32_0 = arith.constant 0 : i32
    return %arg0, %c0_i32 : i32, i32
  }
  func.func @transform_3(%arg0: i32, %arg1: i32) -> (i32, i32) {
    %c0_i32 = arith.constant 0 : i32
    %c0_i32_0 = arith.constant 0 : i32
    return %arg0, %c0_i32 : i32, i32
  }
}

</mosaic_0001>

<bundles_post_ra>
// kernel: tpu_custom_call.1
= control target key start
LH: loop header
LB: loop body
LE: loop exit
PB: predicated region body
PF: predicated region fallthrough
CT: control target
= control target key end

     0   :  { %s503_s12 = smov 0   ;;  %s505_s13 = smov 0   ;;  %s553_s0 = inlined_call_operand.vmem [shape: f32[16,128], index: 0, kind: input, shape index: {}]   ;;  %s554_s1 = inlined_call_operand.vmem [shape: f32[16,4], index: 1, kind: input, shape index: {}]   ;;  %s555_s2 = inlined_call_operand.vmem [shape: s32[16,1], index: 2, kind: input, shape index: {}]   ;;  %s556_s3 = inlined_call_operand.vmem [shape: f32[16,1], index: 3, kind: output, shape index: {}]  }
   0x1   :  { %s507_s14 = smov 0  }
   0x2 LB: > { %s25_s15 = sadd.s32 1, %s473_s13  ;;  %p405_p0 = scmp.ge.s32.totalorder %s477_s14, 1  ;;  %s477_s14 = sphi %s507_s14, %s13_s14   ;;  %s473_s13 = sphi %s505_s13, %s558_s13   ;;  %s469_s12 = sphi %s503_s12, %s557_s12  }
   0x3   : > { %p27_p1 = scmp.ge.s32.totalorder %s25_s15, 2  ;;  %p171_p2 = scmp.lt.s32.totalorder %s477_s14, 3 }
   0x5   : > { %s560_s15 = smov (%p27_p1, %s25_s15), 0  ;;  %p172_p3 = pnand %p405_p0, %p171_p2 }
   0x6   : > { %p204_p4 = scmp.lt.s32.totalorder (!%p172_p3), %s469_s12, 1  ;;  %s481_s23 = smov (!%p172_p3), 127  }
   0x7   : > { %175 = sbr.rel (%p172_p3) target bundleno = 296 (0x128), region = 32 }
   0xc   : > { %v479_v0 = vmov 0   ;;  %v480_v1 = vmov 1   ;;  %s562_s12 = smov (!%p204_p4, %s469_s12), 1  ;;  %vm227_vm0 = vcmask 7168   ;;  %v482_v15 = vmov 0.0  }
   0xd   : > { %443 = vset.pattern.permute.xlu0 %v479_v0  ;;  %445 = vset.pattern.permute.xlu1 %v480_v1  ;;  %s521_s16 = sshll.u32 %s562_s12, 3  ;;  %229 = vst.msk [vmem:[#allocation3] sm:$0xff] %vm227_vm0, %v482_v15  ;;  %v236_v18 = vlaneseq }
   0xe   : > { %s218_s19 = scalar_lea.vmem %s555_s2, %s521_s16  ;;  %s214_s22 = scalar_lea.vmem %s554_s1, %s521_s16  ;;  %228 = vst.msk [vmem:[#allocation2] sm:$0xff] %vm227_vm0, %v482_v15 }
   0xf   : > { %v232_v2 = vld [vmem:[%s218_s19] sm:$0xff]  ;;  %s210_s26 = scalar_lea.vmem %s553_s0, %s521_s16  ;;  %v237_v22 = vand.u32 127, %v236_v18  ;;  %s222_s29 = scalar_lea.vmem %s556_s3, %s521_s16 }
  0x10   : > { %239 = vperm.xlu0 %443, %v232_v2   ;;  %v231_v3 = vld [vmem:[%s214_s22] sm:$0xff] }
  0x11   : > { %271 = vperm.xlu1 %445, %v231_v3   ;;  %v297_v4 = vmul.f32 0.14106724, %v231_v3  ;;  %v264_v5 = vsub.f32 0.0, %v231_v3  ;;  %v230_v6 = vld [vmem:[%s210_s26] sm:$0xff]  ;;  %v296_v35 = vmul.f32 -0.99, %v231_v3 }
  0x12   : > { %v410_v7 = vclamps-f32 %v230_v6, 0.99 }
  0x13   : > { %299 = vrot.lane.b32.xlu2 %v297_v4, %s481_s23 }
  0x14   : > { %v244_v8 = vmul.f32 %v410_v7, %v410_v7  ;;  %v286_v38 = vld [vmem:[#allocation3] sm:$0xff] }
  0x15   : > { %v278_v43 = vld [vmem:[#allocation2] sm:$0xff] }
  0x16   : > { %v245_v9 = vsub.f32 1.0, %v244_v8 }
  0x18   : > { %444 = vset.pattern.permute.xlu0 %v480_v1  ;;  %447 = vrsqrt.f32 %v245_v9  ;;  %vm253_vm1 = vcmp.eq.f32.partialorder %v245_v9, inf  ;;  %v256_v21 = vand.u32 2147483648, %v245_v9  ;;  %vm255_vm2 = vcmp.eq.f32.partialorder %v245_v9, 0.0 }
  0x19   : > { %446 = vset.pattern.permute.xlu1 %v479_v0  ;;  %267 = vperm.xlu0 %444, %v264_v5  }
  0x1a   : > { %260 = vperm.xlu1 %446, %v231_v3  }
  0x1e   : > { %v448_v10 = vpop.eup %447 }
  0x1f   : > { %v247_v11 = vmul.f32 %v448_v10, %v245_v9 }
  0x21   : > { %v248_v12 = vmul.f32 %v448_v10, %v247_v11 }
  0x23   : > { %v249_v13 = vmul.f32 0.5, %v248_v12 }
  0x25   : > { %v250_v14 = vsub.f32 1.5, %v249_v13 }
  0x27   : > { %v251_v16 = vmul.f32 %v448_v10, %v250_v14 }
  0x29   : > { %v252_v20 = vmul.f32 %v251_v16, %v245_v9 }
  0x2b   : > { %v254_v23 = vsel %vm253_vm1, %v245_v9, %v252_v20 }
  0x2c   : > { %v257_v24 = vsel %vm255_vm2, %v256_v21, %v254_v23 }
  0x6d   : > { %v300_v36 = vpop.permute.xlu2 %299 }
  0x6e   : > { %v302_v37 = vadd.f32 %v300_v36, %v296_v35 }
  0x70   : > { %v412_v39 = vadd.f32 -30.0, %v302_v37 }
  0x72   : > { %v304_v42 = vmul.f32 1.442695, %v412_v39 }
  0x82   : > { %v240_v17 = vpop.permute.xlu0 %239 }
  0x83   : > { %v272_v19 = vpop.permute.xlu1 %271  ;;  %vm241_vm3 = vcmp.eq.s32.totalorder %v237_v22, %v240_v17 }
  0x8b   : > { %v268_v25 = vpop.permute.xlu0 %267 }
  0x8c   : > { %v274_v26 = vsel %vm241_vm3, %v268_v25, %v272_v19  ;;  %v261_v27 = vpop.permute.xlu1 %260 }
  0x8d   : > { %v263_v28 = vmul.f32 %v410_v7, %v261_v27  ;;  %v275_v29 = vmul.f32 %v274_v26, %v257_v24 }
  0x8f   : > { %v276_v30 = vadd.f32 %v275_v29, %v263_v28 }
  0x91   : > { %v411_v31 = vadd.f32 -30.0, %v276_v30 }
  0x93   : > { %v287_v32 = vsel %vm241_vm3, %v411_v31, 0.0  ;;  %v279_v33 = vmul.f32 1.442695, %v411_v31 }
  0x94   : > { %288 = vadd.xlane.f32.xlu1 %v287_v32 }
  0x95   : > { %449 = vpow2.f32 %v279_v33 }
  0x96   : > { %451 = vpow2.f32 %v304_v42 }
  0x9b   : > { %v450_v34 = vpop.eup %449 }
  0x9c   : > { %281 = vadd.xlane.f32.xlu2 %v450_v34  ;;  %v452_v46 = vpop.eup %451 }
  0x9d   : > { %v306_v47 = vmul.f32 88.0, %v452_v46 }
 0x107   : > { %v289_v40 = vpop.xlane.xlu1 %288 }
 0x108   : > { %v290_v41 = vadd.f32 %v289_v40, %v286_v38 }
 0x10a   : > { %291 = vst.msk [vmem:[#allocation3] sm:$0xff] %vm227_vm0, %v290_v41 }
 0x10f   : > { %v282_v44 = vpop.xlane.xlu2 %281 }
 0x110   : > { %v283_v45 = vadd.f32 %v282_v44, %v278_v43 }
 0x111   : > { %v310_v52 = vld [vmem:[#allocation3] sm:$0xff] }
 0x112   : > { %285 = vst.msk [vmem:[#allocation2] sm:$0xff] %vm227_vm0, %v283_v45 }
 0x119   : > { %v295_v48 = vld [vmem:[#allocation2] sm:$0xff] }
 0x11a   : > { %v307_v49 = vsub.f32 %v295_v48, %v306_v47 }
 0x11c   : > { %453 = vlog2.f32 %v307_v49 }
 0x122   : > { %v454_v50 = vpop.eup %453 }
 0x123   : > { %v309_v51 = vmul.f32 0.6931472, %v454_v50 }
 0x125   : > { %v311_v53 = vsub.f32 %v309_v51, %v310_v52 }
 0x127   : > { %312 = vst.msk [vmem:[%s222_s29] sm:$0xff] %vm227_vm0, %v311_v53 }
 0x128 PF: > { %s13_s14 = sadd.s32 1, %s477_s14   ;;  %s557_s12 = smov %s473_s13 }
 0x129   : > { %p10_p5 = scmp.ge.s32.totalorder %s13_s14, 4   ;;  %s558_s13 = smov %s560_s15 }
 0x12b   :  { %12 = sbr.rel (!%p10_p5) target bundleno = 2 (0x2), region = 76 }

</bundles_post_ra>
